<compile_context>
chip_gen: v7x
topology: tpu7x:2x2x1
jax: 0.10.0
libtpu: 0.0.40
codegen_flags: <defaults>
</compile_context>

<pallas_src>
import math

import jax
import jax.numpy as jnp
from jax.experimental import pallas as pl
from jax.experimental.pallas import tpu as pltpu

_LANE = 128     # lane width (last dim)
_SUBLANE = 8    # f32 sublane width (second-to-last dim)


def _round_up(x, m):
    return (x + m - 1) // m * m


def _make_fused_mlp_kernel(n_layers, compute_dtype):
    """Fused Linear -> ReLU -> ... -> Linear. Activations never leave the chip."""

    def kernel(x_ref, *args):
        wb_refs = args[: 2 * n_layers]
        o_ref = args[2 * n_layers]
        act = x_ref[...]                                  # [tm, d_in_pad] f32
        for li in range(n_layers):
            w = wb_refs[2 * li][...]                      # [d_in_pad, d_out_pad]
            b = wb_refs[2 * li + 1][...]                  # [1, d_out_pad] f32
            acc = jnp.dot(act.astype(compute_dtype), w.astype(compute_dtype),
                          preferred_element_type=jnp.float32)   # MXU, f32 acc
            acc = acc + b                                 # f32 bias add (VPU)
            if li < n_layers - 1:                         # ReLU on all but output layer
                acc = jnp.maximum(acc, 0.0)
            act = acc                                     # stays in vregs/VMEM
        o_ref[...] = act.astype(o_ref.dtype)

    return kernel


def fused_mlp(x2d, params, *, compute_dtype=jnp.float32):
    """Single pallas_call for the whole MLP.

    x2d: [B, D_in]. params: list of (w [d_in, d_out], b [1, d_out]).
    All dims are zero-padded to (8, 128)-aligned tiles; the result is sliced back.
    """
    B, D_in = x2d.shape
    n_layers = len(params)
    out_dim = params[-1][0].shape[1]

    # ---- padded geometry: lanes to 128, batch to 8 (or tile at 128 rows) ----
    D_in_p = _round_up(D_in, _LANE)
    dims_p = [D_in_p] + [_round_up(w.shape[1], _LANE) for (w, _) in params]

    if B <= _LANE:
        tm = _round_up(B, _SUBLANE)
        B_p = tm
    else:
        tm = _LANE
        B_p = _round_up(B, _LANE)

    x_p = jnp.pad(x2d, ((0, B_p - B), (0, D_in_p - D_in)))

    padded_wb = []
    for li, (w, b) in enumerate(params):
        di, do = w.shape
        di_p, do_p = dims_p[li], dims_p[li + 1]
        padded_wb.append(jnp.pad(w, ((0, di_p - di), (0, do_p - do))))
        padded_wb.append(jnp.pad(b, ((0, 0), (0, do_p - do))))

    # Weights (+ one batch tile) must fit VMEM double-buffered.
    # TODO(synk): add (N, K) tiling with an f32 accumulator for layers too large
    # to hold a full weight block in VMEM (not needed at these shapes).
    itemsize = jnp.dtype(x2d.dtype).itemsize
    weight_bytes = sum(int(a.size) * itemsize for a in padded_wb)
    tile_bytes = (tm * D_in_p + tm * dims_p[-1]) * itemsize
    assert 2 * (weight_bytes + tile_bytes) < 28 * 1024 * 1024, (
        "fused-MLP weights do not fit VMEM; needs K/N tiling")

    kernel = _make_fused_mlp_kernel(n_layers, compute_dtype)

    in_specs = [pl.BlockSpec((tm, D_in_p), lambda i: (i, 0))]
    for li in range(n_layers):
        di_p, do_p = dims_p[li], dims_p[li + 1]
        in_specs.append(pl.BlockSpec((di_p, do_p), lambda i: (0, 0)))   # full weight
        in_specs.append(pl.BlockSpec((1, do_p), lambda i: (0, 0)))      # full bias
    out_specs = pl.BlockSpec((tm, dims_p[-1]), lambda i: (i, 0))

    flops = 2 * B_p * sum(dims_p[li] * dims_p[li + 1] for li in range(n_layers))
    bytes_accessed = (B_p * D_in_p + B_p * dims_p[-1]) * itemsize + weight_bytes

    out_p = pl.pallas_call(
        kernel,
        out_shape=jax.ShapeDtypeStruct((B_p, dims_p[-1]), x2d.dtype),
        grid_spec=pl.GridSpec(
            grid=(B_p // tm,),
            in_specs=in_specs,
            out_specs=out_specs,
        ),
        compiler_params=pltpu.CompilerParams(
            dimension_semantics=("parallel",),        # batch tiles shard across TCs (v7x)
            vmem_limit_bytes=32 * 1024 * 1024,        # safe on v5e/v6e/v7x
        ),
        cost_estimate=pl.CostEstimate(
            flops=flops, transcendentals=0, bytes_accessed=bytes_accessed),
    )(x_p, *padded_wb)

    return out_p[:B, :out_dim]


def init_ffnnx1_params(key, input_dim, hidden_sizes, output_dim, dtype=jnp.float32):
    """Matches PyTorch nn.Linear default init (uniform +-1/sqrt(fan_in)).
    Weights stored as [in, out] (transpose of the PyTorch layout), bias as [1, out]."""
    dims = [input_dim] + list(hidden_sizes) + [output_dim]
    params = []
    for i in range(len(dims) - 1):
        fan_in, fan_out = dims[i], dims[i + 1]
        key, kw, kb = jax.random.split(key, 3)
        bound = 1.0 / math.sqrt(fan_in)
        w = jax.random.uniform(kw, (fan_in, fan_out), dtype, -bound, bound)
        b = jax.random.uniform(kb, (1, fan_out), dtype, -bound, bound)
        params.append((w, b))
    return params


def ffnnx1_forward(x, params, *, compute_dtype=jnp.float32):
    """x.view(B, -1) -> fused (Linear, ReLU)* , Linear — one Pallas kernel."""
    B = x.shape[0]
    x2d = x.reshape(B, -1)
    return fused_mlp(x2d, params, compute_dtype=compute_dtype)


def ffnnx1_reference(x, params):
    """Pure-JAX reference for correctness check."""
    B = x.shape[0]
    x = x.reshape(B, -1)
    n_layers = len(params)
    for li, (w, b) in enumerate(params):
        x = x @ w + b
        if li < n_layers - 1:
            x = jnp.maximum(x, 0.0)
    return x


if __name__ == "__main__":
    key = jax.random.PRNGKey(0)

    # Shapes consistent with the module: image-like input flattened in forward().
    B, C, H, W = 2, 4, 16, 16
    input_dim = C * H * W            # 1024
    hidden_sizes = [32, 32]
    output_dim = 8

    key, kx, kp = jax.random.split(key, 3)
    x = jax.random.normal(kx, (B, C, H, W), jnp.float32)
    params = init_ffnnx1_params(kp, input_dim, hidden_sizes, output_dim)

    ref = ffnnx1_reference(x, params)

    # f32 MXU path (matches reference to tight tolerance).
    out = jax.block_until_ready(ffnnx1_forward(x, params))
    assert out.shape == (B, output_dim), out.shape
    assert jnp.allclose(out, ref, atol=1e-4, rtol=1e-4), \
        f"max abs err = {jnp.max(jnp.abs(out - ref))}"

    # bf16-operand MXU path (v6e/v7x fast path), f32 accumulate/bias/ReLU.
    out_bf16 = jax.block_until_ready(
        ffnnx1_forward(x, params, compute_dtype=jnp.bfloat16))
    assert out_bf16.shape == (B, output_dim), out_bf16.shape
    assert jnp.allclose(out_bf16, ref, atol=5e-2, rtol=5e-2), \
        f"bf16 max abs err = {jnp.max(jnp.abs(out_bf16 - ref))}"

    print("KERNEL_OK")
</pallas_src>

<mosaic_0001>
module attributes {stable_mosaic.version = 11 : i64} {
  func.func @kernel(%arg0: i32, %arg1: memref<8x1024xf32, #tpu.memory_space<vmem>>, %arg2: memref<1024x128xf32, #tpu.memory_space<vmem>>, %arg3: memref<1x128xf32, #tpu.memory_space<vmem>>, %arg4: memref<128x128xf32, #tpu.memory_space<vmem>>, %arg5: memref<1x128xf32, #tpu.memory_space<vmem>>, %arg6: memref<128x128xf32, #tpu.memory_space<vmem>>, %arg7: memref<1x128xf32, #tpu.memory_space<vmem>>, %arg8: memref<8x128xf32, #tpu.memory_space<vmem>>) attributes {dimension_semantics = [#tpu.dimension_semantics<parallel>], iteration_bounds = array<i64: 1>, scalar_prefetch = 0 : i64, scratch_operands = 0 : i64, tpu.core_type = #tpu.core_type<tc>, window_params = [{transform_indices = @transform_0, window_bounds = array<i64: 8, 1024>}, {pipeline_mode = #tpu.pipeline_mode<synchronous>, transform_indices = @transform_1, window_bounds = array<i64: 1024, 128>}, {pipeline_mode = #tpu.pipeline_mode<synchronous>, transform_indices = @transform_2, window_bounds = array<i64: 1, 128>}, {pipeline_mode = #tpu.pipeline_mode<synchronous>, transform_indices = @transform_3, window_bounds = array<i64: 128, 128>}, {pipeline_mode = #tpu.pipeline_mode<synchronous>, transform_indices = @transform_4, window_bounds = array<i64: 1, 128>}, {pipeline_mode = #tpu.pipeline_mode<synchronous>, transform_indices = @transform_5, window_bounds = array<i64: 128, 128>}, {pipeline_mode = #tpu.pipeline_mode<synchronous>, transform_indices = @transform_6, window_bounds = array<i64: 1, 128>}, {transform_indices = @transform_7, window_bounds = array<i64: 8, 128>}]} {
    %c0 = arith.constant 0 : index
    %c0_0 = arith.constant 0 : index
    %0 = vector.load %arg1[%c0, %c0_0] : memref<8x1024xf32, #tpu.memory_space<vmem>>, vector<8x1024xf32>
    %c0_1 = arith.constant 0 : index
    %c0_2 = arith.constant 0 : index
    %1 = vector.load %arg2[%c0_1, %c0_2] : memref<1024x128xf32, #tpu.memory_space<vmem>>, vector<1024x128xf32>
    %c0_3 = arith.constant 0 : index
    %c0_4 = arith.constant 0 : index
    %2 = vector.load %arg3[%c0_3, %c0_4] : memref<1x128xf32, #tpu.memory_space<vmem>>, vector<1x128xf32>
    %cst = arith.constant dense<0.000000e+00> : vector<8x128xf32>
    %3 = tpu.matmul %0, %1, %cst {dimension_numbers = #tpu.dot_dimension_numbers<[1], [0], [0], [1], [0, 0, 1, 1], [], []>} : vector<8x1024xf32>, vector<1024x128xf32>, vector<8x128xf32> -> vector<8x128xf32>
    %4 = vector.broadcast %2 : vector<1x128xf32> to vector<8x128xf32>
    %5 = arith.addf %3, %4 : vector<8x128xf32>
    %cst_5 = arith.constant 0.000000e+00 : f32
    %6 = vector.broadcast %cst_5 : f32 to vector<8x128xf32>
    %7 = arith.maximumf %5, %6 : vector<8x128xf32>
    %c0_6 = arith.constant 0 : index
    %c0_7 = arith.constant 0 : index
    %8 = vector.load %arg4[%c0_6, %c0_7] : memref<128x128xf32, #tpu.memory_space<vmem>>, vector<128x128xf32>
    %c0_8 = arith.constant 0 : index
    %c0_9 = arith.constant 0 : index
    %9 = vector.load %arg5[%c0_8, %c0_9] : memref<1x128xf32, #tpu.memory_space<vmem>>, vector<1x128xf32>
    %cst_10 = arith.constant dense<0.000000e+00> : vector<8x128xf32>
    %10 = tpu.matmul %7, %8, %cst_10 {dimension_numbers = #tpu.dot_dimension_numbers<[1], [0], [0], [1], [0, 0, 1, 1], [], []>} : vector<8x128xf32>, vector<128x128xf32>, vector<8x128xf32> -> vector<8x128xf32>
    %11 = vector.broadcast %9 : vector<1x128xf32> to vector<8x128xf32>
    %12 = arith.addf %10, %11 : vector<8x128xf32>
    %cst_11 = arith.constant 0.000000e+00 : f32
    %13 = vector.broadcast %cst_11 : f32 to vector<8x128xf32>
    %14 = arith.maximumf %12, %13 : vector<8x128xf32>
    %c0_12 = arith.constant 0 : index
    %c0_13 = arith.constant 0 : index
    %15 = vector.load %arg6[%c0_12, %c0_13] : memref<128x128xf32, #tpu.memory_space<vmem>>, vector<128x128xf32>
    %c0_14 = arith.constant 0 : index
    %c0_15 = arith.constant 0 : index
    %16 = vector.load %arg7[%c0_14, %c0_15] : memref<1x128xf32, #tpu.memory_space<vmem>>, vector<1x128xf32>
    %cst_16 = arith.constant dense<0.000000e+00> : vector<8x128xf32>
    %17 = tpu.matmul %14, %15, %cst_16 {dimension_numbers = #tpu.dot_dimension_numbers<[1], [0], [0], [1], [0, 0, 1, 1], [], []>} : vector<8x128xf32>, vector<128x128xf32>, vector<8x128xf32> -> vector<8x128xf32>
    %18 = vector.broadcast %16 : vector<1x128xf32> to vector<8x128xf32>
    %19 = arith.addf %17, %18 : vector<8x128xf32>
    %c0_17 = arith.constant 0 : index
    %c0_18 = arith.constant 0 : index
    %20 = vector.load %arg8[%c0_17, %c0_18] : memref<8x128xf32, #tpu.memory_space<vmem>>, vector<8x128xf32>
    tpu.vector_store %arg8[%c0_17, %c0_18], %19 {strides = array<i32>} : memref<8x128xf32, #tpu.memory_space<vmem>>, vector<8x128xf32>,
    return
  }
  func.func @transform_0(%arg0: i32) -> (i32, i32) {
    %c0_i32 = arith.constant 0 : i32
    %c0_i32_0 = arith.constant 0 : i32
    return %arg0, %c0_i32 : i32, i32
  }
  func.func @transform_1(%arg0: i32) -> (i32, i32) {
    %c0_i32 = arith.constant 0 : i32
    %c0_i32_0 = arith.constant 0 : i32
    %c0_i32_1 = arith.constant 0 : i32
    return %c0_i32, %c0_i32_0 : i32, i32
  }
  func.func @transform_2(%arg0: i32) -> (i32, i32) {
    %c0_i32 = arith.constant 0 : i32
    %c0_i32_0 = arith.constant 0 : i32
    %c0_i32_1 = arith.constant 0 : i32
    return %c0_i32, %c0_i32_0 : i32, i32
  }
  func.func @transform_3(%arg0: i32) -> (i32, i32) {
    %c0_i32 = arith.constant 0 : i32
    %c0_i32_0 = arith.constant 0 : i32
    %c0_i32_1 = arith.constant 0 : i32
    return %c0_i32, %c0_i32_0 : i32, i32
  }
  func.func @transform_4(%arg0: i32) -> (i32, i32) {
    %c0_i32 = arith.constant 0 : i32
    %c0_i32_0 = arith.constant 0 : i32
    %c0_i32_1 = arith.constant 0 : i32
    return %c0_i32, %c0_i32_0 : i32, i32
  }
  func.func @transform_5(%arg0: i32) -> (i32, i32) {
    %c0_i32 = arith.constant 0 : i32
    %c0_i32_0 = arith.constant 0 : i32
    %c0_i32_1 = arith.constant 0 : i32
    return %c0_i32, %c0_i32_0 : i32, i32
  }
  func.func @transform_6(%arg0: i32) -> (i32, i32) {
    %c0_i32 = arith.constant 0 : i32
    %c0_i32_0 = arith.constant 0 : i32
    %c0_i32_1 = arith.constant 0 : i32
    return %c0_i32, %c0_i32_0 : i32, i32
  }
  func.func @transform_7(%arg0: i32) -> (i32, i32) {
    %c0_i32 = arith.constant 0 : i32
    %c0_i32_0 = arith.constant 0 : i32
    return %arg0, %c0_i32 : i32, i32
  }
}

</mosaic_0001>

<bundles_post_ra>
// kernel: tpu_custom_call.1
= control target key start
LH: loop header
LB: loop body
LE: loop exit
PB: predicated region body
PF: predicated region fallthrough
CT: control target
= control target key end

     0   :  { %12 = vsyncpa [#allocation3], 0  ;;  %s1404_s0 = inlined_call_operand.hbm [shape: f32[8,1024], index: 0, kind: input, shape index: {}]   ;;  %s1405_s1 = inlined_call_operand.hbm [shape: f32[1024,128], index: 1, kind: input, shape index: {}]   ;;  %s1406_s2 = inlined_call_operand.vmem [shape: f32[1,128], index: 2, kind: input, shape index: {}]   ;;  %s1407_s3 = inlined_call_operand.hbm [shape: f32[128,128], index: 3, kind: input, shape index: {}]   ;;  %s1408_s4 = inlined_call_operand.vmem [shape: f32[1,128], index: 4, kind: input, shape index: {}]   ;;  %s1409_s5 = inlined_call_operand.hbm [shape: f32[128,128], index: 5, kind: input, shape index: {}]   ;;  %s1410_s6 = inlined_call_operand.vmem [shape: f32[1,128], index: 6, kind: input, shape index: {}]   ;;  %s1411_s7 = inlined_call_operand.hbm [shape: f32[8,128], index: 7, kind: output, shape index: {}]  }
   0x1   :  { %13 = vsyncpa [#allocation6], 0 }
   0x2   :  { %14 = vsyncpa [#allocation9], 0 }
   0x3   :  { %15 = vsyncpa [#allocation4], 0  ;;  %s1260_s24 = smov [#allocation5]   ;;  %s1142_s28 = scalar_lea.hbm %s1405_s1, 16384 }
   0x4   :  { %s31_s25 = sshll.u32 %s1260_s24, 4  ;;  %p1143_p0 = scmp.ne.s32.totalorder %s1405_s1, %s1142_s28  ;;  %s32_s25 = int_to_ptr.vmem [resolvable:$true] %s31_s25 }
   0x5   :  { %p1146_p1 = scmp.lt.u32.totalorder %s1142_s28, %s1405_s1 }
   0x7   :  { %p1148_p2 = pnand %p1146_p1, %p1143_p0 }
   0x9   :  { %1151 = shalt.err (!%p1148_p2)
}
   0xa   :  { %s1152_s10 = scalar_lea.vmem %s32_s25, 16384  ;;  %p1157_p4 = scmp.lt.s32.totalorder %s32_s25, %s32_s25 }
   0xb   :  { %p1153_p3 = scmp.ne.s32.totalorder %s32_s25, %s1152_s10  ;;  %p1158_p5 = scmp.lt.s32.totalorder %s1152_s10, %s1152_s10 }
   0xd   :  { %p1159_p6 = por %p1158_p5, %p1157_p4 }
   0xf   :  { %p1160_p7 = pnand %p1159_p6, %p1153_p3 }
  0x11   :  { %1163 = shalt.err (!%p1160_p7)
}
  0x12   :  { %s1261_s11 = smov 128   ;;  %s1262_s12 = smov 8  }
  0x13   :  { %37 = dma.hbm_to_vmem [thread:$0]  %s1405_s1, 16384, %s32_s25, [#allocation6], %s1261_s11, %s1261_s11, %s1262_s12  }
  0x14   :  { %s1263_s15 = smov [#allocation2]   ;;  %s1264_s17 = smov [#allocation7]  }
  0x15   :  { %s22_s16 = sshll.u32 %s1263_s15, 4  ;;  %s45_s18 = sshll.u32 %s1264_s17, 4  ;;  %s23_s16 = int_to_ptr.vmem [resolvable:$true] %s22_s16  ;;  %s46_s18 = int_to_ptr.vmem [resolvable:$true] %s45_s18 }
  0x16   :  { %s1164_s21 = scalar_lea.hbm %s1404_s0, 1024 }
  0x17   :  { %p1165_p8 = scmp.ne.s32.totalorder %s1404_s0, %s1164_s21  ;;  %p1168_p9 = scmp.lt.u32.totalorder %s1164_s21, %s1404_s0 }
  0x19   :  { %p1170_p10 = pnand %p1168_p9, %p1165_p8 }
  0x1b   :  { %1173 = shalt.err (!%p1170_p10)
}
  0x1c   :  { %s1174_s1 = scalar_lea.vmem %s23_s16, 1024  ;;  %p1179_p12 = scmp.lt.s32.totalorder %s23_s16, %s23_s16 }
  0x1d   :  { %p1175_p11 = scmp.ne.s32.totalorder %s23_s16, %s1174_s1  ;;  %p1180_p13 = scmp.lt.s32.totalorder %s1174_s1, %s1174_s1 }
  0x1f   :  { %p1181_p0 = por %p1180_p13, %p1179_p12 }
  0x21   :  { %p1182_p1 = pnand %p1181_p0, %p1175_p11 }
  0x23   :  { %1185 = shalt.err (!%p1182_p1)
}
  0x24   :  { %25 = dma.hbm_to_vmem [thread:$0]  %s1404_s0, 1024, %s23_s16, [#allocation3]  }
  0x25   :  { %s1186_s30 = scalar_lea.hbm %s1407_s3, 2048 }
  0x26   :  { %p1187_p2 = scmp.ne.s32.totalorder %s1407_s3, %s1186_s30  ;;  %p1190_p3 = scmp.lt.u32.totalorder %s1186_s30, %s1407_s3 }
  0x28   :  { %p1192_p4 = pnand %p1190_p3, %p1187_p2 }
  0x2a   :  { %1195 = shalt.err (!%p1192_p4)
}
  0x2b   :  { %s1196_s14 = scalar_lea.vmem %s46_s18, 2048  ;;  %p1201_p6 = scmp.lt.s32.totalorder %s46_s18, %s46_s18 }
  0x2c   :  { %p1197_p5 = scmp.ne.s32.totalorder %s46_s18, %s1196_s14  ;;  %p1202_p7 = scmp.lt.s32.totalorder %s1196_s14, %s1196_s14 }
  0x2e   :  { %p1203_p8 = por %p1202_p7, %p1201_p6 }
  0x30   :  { %p1204_p9 = pnand %p1203_p8, %p1197_p5 }
  0x32   :  { %1207 = shalt.err (!%p1204_p9)
}
  0x33   :  { %51 = dma.hbm_to_vmem [thread:$0]  %s1407_s3, 2048, %s46_s18, [#allocation6], %s1261_s11, %s1261_s11, %s1262_s12  }
  0x34   :  { %s1265_s16 = smov [#allocation8]   ;;  %s1208_s21 = scalar_lea.hbm %s1409_s5, 2048 }
  0x35   :  { %s59_s17 = sshll.u32 %s1265_s16, 4  ;;  %p1209_p10 = scmp.ne.s32.totalorder %s1409_s5, %s1208_s21  ;;  %s60_s17 = int_to_ptr.vmem [resolvable:$true] %s59_s17 }
  0x36   :  { %p1212_p11 = scmp.lt.u32.totalorder %s1208_s21, %s1409_s5 }
  0x38   :  { %p1214_p12 = pnand %p1212_p11, %p1209_p10 }
  0x3a   :  { %1217 = shalt.err (!%p1214_p12)
}
  0x3b   :  { %s1218_s1 = scalar_lea.vmem %s60_s17, 2048  ;;  %p1223_p0 = scmp.lt.s32.totalorder %s60_s17, %s60_s17 }
  0x3c   :  { %p1219_p13 = scmp.ne.s32.totalorder %s60_s17, %s1218_s1  ;;  %p1224_p1 = scmp.lt.s32.totalorder %s1218_s1, %s1218_s1 }
  0x3e   :  { %p1225_p2 = por %p1224_p1, %p1223_p0 }
  0x40   :  { %p1226_p3 = pnand %p1225_p2, %p1219_p13 }
  0x42   :  { %1229 = shalt.err (!%p1226_p3)
}
  0x43   :  { %65 = dma.hbm_to_vmem [thread:$0]  %s1409_s5, 2048, %s60_s17, [#allocation9], %s1261_s11, %s1261_s11, %s1262_s12  }
  0x44   :  { %1252 = dma.done.wait [#allocation3], 1024  }
  0x45   :  { %1253 = vsyncadd [#allocation3], 4294966272 }
  0x46   :  { %1254 = dma.done.wait [#allocation6], 18432  }
  0x47   :  { %1255 = vsyncadd [#allocation6], 4294948864 }
  0x48   :  { %1256 = dma.done.wait [#allocation9], 2048  }
  0x49   :  { %1257 = vsyncadd [#allocation9], 4294965248  ;;  %v104_v0 = vld [vmem:[#allocation5 + $0x80] sm:$0xff]  ;;  %v105_v1 = vld [vmem:[#allocation5 + $0x88] sm:$0xff]  ;;  %vm1267_vm0 = vmmov 0   ;;  %s1269_s28 = smov [#allocation10]  }
  0x4a   :  { %v88_v2 = vld [vmem:[#allocation5] sm:$0xff]  ;;  %v956_v3 = vpack.c.bf16 %v105_v1, %v104_v0  ;;  %v89_v4 = vld [vmem:[#allocation5 + $0x8] sm:$0xff]  ;;  %v106_v11 = vld [vmem:[#allocation5 + $0x90] sm:$0xff]  ;;  %s698_s29 = sshll.u32 %s1269_s28, 4  ;;  %s699_s29 = int_to_ptr.vmem [resolvable:$true] %s698_s29 }
  0x4b   :  { %v136_v5 = vld [vmem:[#allocation5 + $0x180] sm:$0xff]  ;;  %v137_v6 = vld [vmem:[#allocation5 + $0x188] sm:$0xff]  ;;  %v958_v7 = vpack.c.bf16 %v89_v4, %v88_v2  ;;  %v107_v13 = vld [vmem:[#allocation5 + $0x98] sm:$0xff]  ;;  %s1230_s30 = scalar_lea.vmem %s699_s29, 128  ;;  %p1235_p5 = scmp.lt.s32.totalorder %s699_s29, %s699_s29 }
  0x4c   :  { %v988_v8 = vpack.c.bf16 %v137_v6, %v136_v5  ;;  %v120_v9 = vld [vmem:[#allocation5 + $0x100] sm:$0xff]  ;;  %v121_v10 = vld [vmem:[#allocation5 + $0x108] sm:$0xff]  ;;  %957 = vmatprep.subr.bf16.mxu0 %v956_v3  ;;  %v90_v14 = vld [vmem:[#allocation5 + $0x10] sm:$0xff]  ;;  %v960_v16 = vpack.c.bf16 %v107_v13, %v106_v11  ;;  %p1231_p4 = scmp.ne.s32.totalorder %s699_s29, %s1230_s30  ;;  %p1236_p6 = scmp.lt.s32.totalorder %s1230_s30, %s1230_s30 }
  0x4d   :  { %v990_v12 = vpack.c.bf16 %v121_v10, %v120_v9  ;;  %v91_v15 = vld [vmem:[#allocation5 + $0x18] sm:$0xff]  ;;  %959 = vmatpush3.bf16.msra.mxu0 %v958_v7  ;;  %v138_v18 = vld [vmem:[#allocation5 + $0x190] sm:$0xff]  ;;  %v108_v23 = vld [vmem:[#allocation5 + $0xa0] sm:$0xff] }
  0x4e   :  { %989 = vmatprep.subr.bf16.mxu1 %v988_v8  ;;  %v962_v17 = vpack.c.bf16 %v91_v15, %v90_v14  ;;  %v139_v19 = vld [vmem:[#allocation5 + $0x198] sm:$0xff]  ;;  %v122_v20 = vld [vmem:[#allocation5 + $0x110] sm:$0xff]  ;;  %v109_v24 = vld [vmem:[#allocation5 + $0xa8] sm:$0xff]  ;;  %961 = vmatprep.subr.bf16.mxu0 %v960_v16  ;;  %p1237_p7 = por %p1236_p6, %p1235_p5 }
  0x4f   :  { %991 = vmatpush3.bf16.msra.mxu1 %v990_v12  ;;  %v992_v21 = vpack.c.bf16 %v139_v19, %v138_v18  ;;  %v123_v22 = vld [vmem:[#allocation5 + $0x118] sm:$0xff]  ;;  %v964_v26 = vpack.c.bf16 %v109_v24, %v108_v23  ;;  %v92_v27 = vld [vmem:[#allocation5 + $0x20] sm:$0xff]  ;;  %v93_v28 = vld [vmem:[#allocation5 + $0x28] sm:$0xff] }
  0x50   :  { %v994_v25 = vpack.c.bf16 %v123_v22, %v122_v20  ;;  %v140_v29 = vld [vmem:[#allocation5 + $0x1a0] sm:$0xff]  ;;  %v141_v30 = vld [vmem:[#allocation5 + $0x1a8] sm:$0xff]  ;;  %v966_v33 = vpack.c.bf16 %v93_v28, %v92_v27  ;;  %v110_v35 = vld [vmem:[#allocation5 + $0xb0] sm:$0xff]  ;;  %p1238_p8 = pnand %p1237_p7, %p1231_p4 }
  0x51   :  { %993 = vmatprep.subr.bf16.mxu1 %v992_v21  ;;  %v124_v31 = vld [vmem:[#allocation5 + $0x120] sm:$0xff]  ;;  %v125_v32 = vld [vmem:[#allocation5 + $0x128] sm:$0xff]  ;;  %963 = vmatpush3.bf16.msra.mxu0 %v962_v17  ;;  %v996_v34 = vpack.c.bf16 %v141_v30, %v140_v29  ;;  %v111_v36 = vld [vmem:[#allocation5 + $0xb8] sm:$0xff] }
  0x52   :  { %v94_v37 = vld [vmem:[#allocation5 + $0x30] sm:$0xff]  ;;  %965 = vmatprep.subr.bf16.mxu0 %v964_v26  ;;  %v998_v38 = vpack.c.bf16 %v125_v32, %v124_v31  ;;  %v968_v39 = vpack.c.bf16 %v111_v36, %v110_v35  ;;  %v95_v40 = vld [vmem:[#allocation5 + $0x38] sm:$0xff]  ;;  %v112_v46 = vld [vmem:[#allocation5 + $0xc0] sm:$0xff] }
  0x53   :  { %995 = vmatpush3.bf16.msra.mxu1 %v994_v25  ;;  %v142_v41 = vld [vmem:[#allocation5 + $0x1b0] sm:$0xff]  ;;  %v143_v42 = vld [vmem:[#allocation5 + $0x1b8] sm:$0xff]  ;;  %v113_v47 = vld [vmem:[#allocation5 + $0xc8] sm:$0xff]  ;;  %v970_v48 = vpack.c.bf16 %v95_v40, %v94_v37 }
  0x54   :  { %997 = vmatprep.subr.bf16.mxu1 %v996_v34  ;;  %v1000_v43 = vpack.c.bf16 %v143_v42, %v142_v41  ;;  %v126_v44 = vld [vmem:[#allocation5 + $0x130] sm:$0xff]  ;;  %v127_v45 = vld [vmem:[#allocation5 + $0x138] sm:$0xff]  ;;  %v144_v49 = vld [vmem:[#allocation5 + $0x1c0] sm:$0xff]  ;;  %v972_v52 = vpack.c.bf16 %v113_v47, %v112_v46 }
  0x55   :  { %967 = vmatpush3.bf16.msra.mxu0 %v966_v33  ;;  %v145_v50 = vld [vmem:[#allocation5 + $0x1c8] sm:$0xff]  ;;  %v1002_v51 = vpack.c.bf16 %v127_v45, %v126_v44  ;;  %v96_v53 = vld [vmem:[#allocation5 + $0x40] sm:$0xff]  ;;  %v114_v58 = vld [vmem:[#allocation5 + $0xd0] sm:$0xff] }
  0x56   :  { %969 = vmatprep.subr.bf16.mxu0 %v968_v39  ;;  %v97_v54 = vld [vmem:[#allocation5 + $0x48] sm:$0xff]  ;;  %v128_v55 = vld [vmem:[#allocation5 + $0x140] sm:$0xff]  ;;  %v1004_v56 = vpack.c.bf16 %v145_v50, %v144_v49  ;;  %v115_v59 = vld [vmem:[#allocation5 + $0xd8] sm:$0xff] }
  0x57   :  { %999 = vmatpush3.bf16.msra.mxu1 %v998_v38  ;;  %v129_v57 = vld [vmem:[#allocation5 + $0x148] sm:$0xff]  ;;  %v146_v60 = vld [vmem:[#allocation5 + $0x1d0] sm:$0xff]  ;;  %v147_v61 = vld [vmem:[#allocation5 + $0x1d8] sm:$0xff]  ;;  %v974_v62 = vpack.c.bf16 %v97_v54, %v96_v53  ;;  %v976_v0 = vpack.c.bf16 %v115_v59, %v114_v58 }
  0x58   :  { %1001 = vmatprep.subr.bf16.mxu1 %v1000_v43  ;;  %v1006_v63 = vpack.c.bf16 %v129_v57, %v128_v55  ;;  %v98_v1 = vld [vmem:[#allocation5 + $0x50] sm:$0xff]  ;;  %v99_v2 = vld [vmem:[#allocation5 + $0x58] sm:$0xff]  ;;  %v1008_v4 = vpack.c.bf16 %v147_v61, %v146_v60  ;;  %v116_v6 = vld [vmem:[#allocation5 + $0xe0] sm:$0xff] }
  0x59   :  { %971 = vmatpush3.bf16.msra.mxu0 %v970_v48  ;;  %v130_v3 = vld [vmem:[#allocation5 + $0x150] sm:$0xff]  ;;  %v131_v5 = vld [vmem:[#allocation5 + $0x158] sm:$0xff]  ;;  %v117_v7 = vld [vmem:[#allocation5 + $0xe8] sm:$0xff]  ;;  %v978_v10 = vpack.c.bf16 %v99_v2, %v98_v1 }
  0x5a   :  { %973 = vmatprep.subr.bf16.mxu0 %v972_v52  ;;  %v148_v8 = vld [vmem:[#allocation5 + $0x1e0] sm:$0xff]  ;;  %v149_v9 = vld [vmem:[#allocation5 + $0x1e8] sm:$0xff]  ;;  %v1010_v13 = vpack.c.bf16 %v131_v5, %v130_v3  ;;  %v980_v14 = vpack.c.bf16 %v117_v7, %v116_v6  ;;  %v118_v19 = vld [vmem:[#allocation5 + $0xf0] sm:$0xff] }
  0x5b   :  { %1003 = vmatpush3.bf16.msra.mxu1 %v1002_v51  ;;  %v100_v11 = vld [vmem:[#allocation5 + $0x60] sm:$0xff]  ;;  %v101_v12 = vld [vmem:[#allocation5 + $0x68] sm:$0xff]  ;;  %v1012_v18 = vpack.c.bf16 %v149_v9, %v148_v8  ;;  %v119_v20 = vld [vmem:[#allocation5 + $0xf8] sm:$0xff] }
  0x5c   :  { %1005 = vmatprep.subr.bf16.mxu1 %v1004_v56  ;;  %v132_v15 = vld [vmem:[#allocation5 + $0x160] sm:$0xff]  ;;  %v133_v16 = vld [vmem:[#allocation5 + $0x168] sm:$0xff]  ;;  %v83_v21 = vld [vmem:[#allocation2 + $0x18] sm:$0xff]  ;;  %v982_v24 = vpack.c.bf16 %v101_v12, %v100_v11  ;;  %v984_v26 = vpack.c.bf16 %v119_v20, %v118_v19 }
  0x5d   :  { %975 = vmatpush3.bf16.msra.mxu0 %v974_v62  ;;  %v81_v17 = vld [vmem:[#allocation2 + $0x8] sm:$0xff]  ;;  %v150_v22 = vld [vmem:[#allocation5 + $0x1f0] sm:$0xff]  ;;  %v151_v23 = vld [vmem:[#allocation5 + $0x1f8] sm:$0xff]  ;;  %357 = vmatprep.mubr.f32.mxu1 %v83_v21  ;;  %v1014_v25 = vpack.c.bf16 %v133_v16, %v132_v15 }
  0x5e   :  { %977 = vmatprep.subr.bf16.mxu0 %v976_v0  ;;  %287 = vmatprep.mubr.f32.mxu0 %v81_v17  ;;  %v102_v27 = vld [vmem:[#allocation5 + $0x70] sm:$0xff]  ;;  %v103_v28 = vld [vmem:[#allocation5 + $0x78] sm:$0xff]  ;;  %v1016_v30 = vpack.c.bf16 %v151_v23, %v150_v22  ;;  %v168_v32 = vld [vmem:[#allocation5 + $0x280] sm:$0xff] }
  0x5f   :  { %1007 = vmatpush3.bf16.msra.mxu1 %v1006_v63  ;;  %v134_v29 = vld [vmem:[#allocation5 + $0x170] sm:$0xff]  ;;  %v135_v31 = vld [vmem:[#allocation5 + $0x178] sm:$0xff]  ;;  %v169_v33 = vld [vmem:[#allocation5 + $0x288] sm:$0xff]  ;;  %v986_v36 = vpack.c.bf16 %v103_v28, %v102_v27 }
  0x60   :  { %1009 = vmatprep.subr.bf16.mxu1 %v1008_v4  ;;  %v200_v34 = vld [vmem:[#allocation5 + $0x380] sm:$0xff]  ;;  %v201_v35 = vld [vmem:[#allocation5 + $0x388] sm:$0xff]  ;;  %v1018_v37 = vpack.c.bf16 %v135_v31, %v134_v29  ;;  %v1020_v38 = vpack.c.bf16 %v169_v33, %v168_v32  ;;  %v170_v44 = vld [vmem:[#allocation5 + $0x290] sm:$0xff] }
  0x61   :  { %979 = vmatpush3.bf16.msra.mxu0 %v978_v10  ;;  %v152_v39 = vld [vmem:[#allocation5 + $0x200] sm:$0xff]  ;;  %v153_v40 = vld [vmem:[#allocation5 + $0x208] sm:$0xff]  ;;  %v1052_v42 = vpack.c.bf16 %v201_v35, %v200_v34  ;;  %v171_v45 = vld [vmem:[#allocation5 + $0x298] sm:$0xff] }
  0x62   :  { %981 = vmatprep.subr.bf16.mxu0 %v980_v14  ;;  %v184_v41 = vld [vmem:[#allocation5 + $0x300] sm:$0xff]  ;;  %v185_v43 = vld [vmem:[#allocation5 + $0x308] sm:$0xff]  ;;  %v202_v46 = vld [vmem:[#allocation5 + $0x390] sm:$0xff]  ;;  %v1022_v49 = vpack.c.bf16 %v153_v40, %v152_v39  ;;  %v1024_v52 = vpack.c.bf16 %v171_v45, %v170_v44 }
  0x63   :  { %1011 = vmatpush3.bf16.msra.mxu1 %v1010_v13  ;;  %v203_v47 = vld [vmem:[#allocation5 + $0x398] sm:$0xff]  ;;  %v80_v48 = vld [vmem:[#allocation2] sm:$0xff]  ;;  %v82_v50 = vld [vmem:[#allocation2 + $0x10] sm:$0xff]  ;;  %v1054_v51 = vpack.c.bf16 %v185_v43, %v184_v41 }
  0x64   :  { %1013 = vmatprep.subr.bf16.mxu1 %v1012_v18  ;;  %v154_v53 = vld [vmem:[#allocation5 + $0x210] sm:$0xff]  ;;  %v155_v54 = vld [vmem:[#allocation5 + $0x218] sm:$0xff]  ;;  %v1056_v56 = vpack.c.bf16 %v203_v47, %v202_v46  ;;  %v172_v58 = vld [vmem:[#allocation5 + $0x2a0] sm:$0xff] }
  0x65   :  { %983 = vmatpush3.bf16.msra.mxu0 %v982_v24  ;;  %v186_v55 = vld [vmem:[#allocation5 + $0x310] sm:$0xff]  ;;  %v187_v57 = vld [vmem:[#allocation5 + $0x318] sm:$0xff]  ;;  %v173_v59 = vld [vmem:[#allocation5 + $0x2a8] sm:$0xff]  ;;  %v1026_v62 = vpack.c.bf16 %v155_v54, %v154_v53 }
  0x66   :  { %985 = vmatprep.subr.bf16.mxu0 %v984_v26  ;;  %v204_v60 = vld [vmem:[#allocation5 + $0x3a0] sm:$0xff]  ;;  %v205_v61 = vld [vmem:[#allocation5 + $0x3a8] sm:$0xff]  ;;  %v1058_v63 = vpack.c.bf16 %v187_v57, %v186_v55  ;;  %v1028_v0 = vpack.c.bf16 %v173_v59, %v172_v58  ;;  %v174_v6 = vld [vmem:[#allocation5 + $0x2b0] sm:$0xff] }
  0x67   :  { %1015 = vmatpush3.bf16.msra.mxu1 %v1014_v25  ;;  %v156_v1 = vld [vmem:[#allocation5 + $0x220] sm:$0xff]  ;;  %v157_v2 = vld [vmem:[#allocation5 + $0x228] sm:$0xff]  ;;  %v1060_v4 = vpack.c.bf16 %v205_v61, %v204_v60  ;;  %v175_v7 = vld [vmem:[#allocation5 + $0x2b8] sm:$0xff] }
  0x68   :  { %1017 = vmatprep.subr.bf16.mxu1 %v1016_v30  ;;  %v188_v3 = vld [vmem:[#allocation5 + $0x320] sm:$0xff]  ;;  %v189_v5 = vld [vmem:[#allocation5 + $0x328] sm:$0xff]  ;;  %v206_v8 = vld [vmem:[#allocation5 + $0x3b0] sm:$0xff]  ;;  %v1030_v10 = vpack.c.bf16 %v157_v2, %v156_v1  ;;  %v1032_v12 = vpack.c.bf16 %v175_v7, %v174_v6 }
  0x69   :  { %987 = vmatpush3.bf16.msra.mxu0 %v986_v36  ;;  %v207_v9 = vld [vmem:[#allocation5 + $0x3b8] sm:$0xff]  ;;  %v1062_v11 = vpack.c.bf16 %v189_v5, %v188_v3  ;;  %v158_v13 = vld [vmem:[#allocation5 + $0x230] sm:$0xff]  ;;  %v176_v18 = vld [vmem:[#allocation5 + $0x2c0] sm:$0xff] }
  0x6a   :  { %1021 = vmatprep.subr.bf16.mxu0 %v1020_v38  ;;  %v159_v14 = vld [vmem:[#allocation5 + $0x238] sm:$0xff]  ;;  %v190_v15 = vld [vmem:[#allocation5 + $0x330] sm:$0xff]  ;;  %v1064_v16 = vpack.c.bf16 %v207_v9, %v206_v8  ;;  %v177_v19 = vld [vmem:[#allocation5 + $0x2c8] sm:$0xff] }
  0x6b   :  { %1019 = vmatpush3.bf16.msra.mxu1 %v1018_v37  ;;  %v191_v17 = vld [vmem:[#allocation5 + $0x338] sm:$0xff]  ;;  %v208_v20 = vld [vmem:[#allocation5 + $0x3c0] sm:$0xff]  ;;  %v209_v21 = vld [vmem:[#allocation5 + $0x3c8] sm:$0xff]  ;;  %v1034_v22 = vpack.c.bf16 %v159_v14, %v158_v13  ;;  %v1036_v26 = vpack.c.bf16 %v177_v19, %v176_v18 }
  0x6c   :  { %1053 = vmatprep.subr.bf16.mxu1 %v1052_v42  ;;  %288 = vmatmul.mubr.f32.vlgmr.msra.gmra.mrb[0].mxu0 %v80_v48  ;;  %v85_v23 = vld [vmem:[#allocation2 + $0x28] sm:$0xff]  ;;  %v87_v24 = vld [vmem:[#allocation2 + $0x38] sm:$0xff]  ;;  %v1066_v25 = vpack.c.bf16 %v191_v17, %v190_v15  ;;  %v160_v27 = vld [vmem:[#allocation5 + $0x240] sm:$0xff]  ;;  %v1068_v30 = vpack.c.bf16 %v209_v21, %v208_v20 }
  0x6d   :  { %1023 = vmatpush3.bf16.msra.mxu0 %v1022_v49  ;;  %v161_v28 = vld [vmem:[#allocation5 + $0x248] sm:$0xff]  ;;  %v192_v29 = vld [vmem:[#allocation5 + $0x340] sm:$0xff]  ;;  %v178_v32 = vld [vmem:[#allocation5 + $0x2d0] sm:$0xff]  ;;  %427 = vmatprep.mubr.f32.mxu0 %v85_v23 }
  0x6e   :  { %358 = vmatmul.mubr.f32.vlgmr.msra.gmra.mrb[0].mxu1 %v82_v50  ;;  %1025 = vmatprep.subr.bf16.mxu0 %v1024_v52  ;;  %v193_v31 = vld [vmem:[#allocation5 + $0x348] sm:$0xff]  ;;  %v179_v33 = vld [vmem:[#allocation5 + $0x2d8] sm:$0xff]  ;;  %v210_v34 = vld [vmem:[#allocation5 + $0x3d0] sm:$0xff]  ;;  %v1038_v36 = vpack.c.bf16 %v161_v28, %v160_v27 }
  0x6f   :  { %1055 = vmatpush3.bf16.msra.mxu1 %v1054_v51  ;;  %v211_v35 = vld [vmem:[#allocation5 + $0x3d8] sm:$0xff]  ;;  %497 = vmatprep.mubr.f32.mxu1 %v87_v24  ;;  %v1070_v37 = vpack.c.bf16 %v193_v31, %v192_v29  ;;  %v1040_v38 = vpack.c.bf16 %v179_v33, %v178_v32  ;;  %v162_v39 = vld [vmem:[#allocation5 + $0x250] sm:$0xff]  ;;  %v180_v44 = vld [vmem:[#allocation5 + $0x2e0] sm:$0xff]  ;;  %v1268_v33 = vmov 0.0  }
  0x70   :  { %1057 = vmatprep.subr.bf16.mxu1 %v1056_v56  ;;  %v163_v40 = vld [vmem:[#allocation5 + $0x258] sm:$0xff]  ;;  %v194_v41 = vld [vmem:[#allocation5 + $0x350] sm:$0xff]  ;;  %v1072_v42 = vpack.c.bf16 %v211_v35, %v210_v34  ;;  %v181_v45 = vld [vmem:[#allocation5 + $0x2e8] sm:$0xff] }
  0x71   :  { %1027 = vmatpush3.bf16.msra.mxu0 %v1026_v62  ;;  %v195_v43 = vld [vmem:[#allocation5 + $0x358] sm:$0xff]  ;;  %v212_v46 = vld [vmem:[#allocation5 + $0x3e0] sm:$0xff]  ;;  %v213_v47 = vld [vmem:[#allocation5 + $0x3e8] sm:$0xff]  ;;  %v1042_v48 = vpack.c.bf16 %v163_v40, %v162_v39  ;;  %v1044_v50 = vpack.c.bf16 %v181_v45, %v180_v44 }
  0x72   :  { %1029 = vmatprep.subr.bf16.mxu0 %v1028_v0  ;;  %v1074_v49 = vpack.c.bf16 %v195_v43, %v194_v41  ;;  %v164_v51 = vld [vmem:[#allocation5 + $0x260] sm:$0xff]  ;;  %v165_v52 = vld [vmem:[#allocation5 + $0x268] sm:$0xff]  ;;  %v1076_v54 = vpack.c.bf16 %v213_v47, %v212_v46  ;;  %v182_v56 = vld [vmem:[#allocation5 + $0x2f0] sm:$0xff] }
  0x73   :  { %1059 = vmatpush3.bf16.msra.mxu1 %v1058_v63  ;;  %v196_v53 = vld [vmem:[#allocation5 + $0x360] sm:$0xff]  ;;  %v197_v55 = vld [vmem:[#allocation5 + $0x368] sm:$0xff]  ;;  %v183_v57 = vld [vmem:[#allocation5 + $0x2f8] sm:$0xff]  ;;  %v1046_v60 = vpack.c.bf16 %v165_v52, %v164_v51 }
  0x74   :  { %1061 = vmatprep.subr.bf16.mxu1 %v1060_v4  ;;  %v214_v58 = vld [vmem:[#allocation5 + $0x3f0] sm:$0xff]  ;;  %v215_v59 = vld [vmem:[#allocation5 + $0x3f8] sm:$0xff]  ;;  %v1078_v61 = vpack.c.bf16 %v197_v55, %v196_v53  ;;  %v1048_v62 = vpack.c.bf16 %v183_v57, %v182_v56  ;;  %v84_v6 = vld [vmem:[#allocation2 + $0x20] sm:$0xff] }
  0x75   :  { %1031 = vmatpush3.bf16.msra.mxu0 %v1030_v10  ;;  %v166_v63 = vld [vmem:[#allocation5 + $0x270] sm:$0xff]  ;;  %v167_v0 = vld [vmem:[#allocation5 + $0x278] sm:$0xff]  ;;  %v1080_v1 = vpack.c.bf16 %v215_v59, %v214_v58  ;;  %v504_v8 = vld [vmem:[#allocation7] sm:$0xff] }
  0x76   :  { %1033 = vmatprep.subr.bf16.mxu0 %v1032_v12  ;;  %v198_v2 = vld [vmem:[#allocation5 + $0x370] sm:$0xff]  ;;  %v199_v3 = vld [vmem:[#allocation5 + $0x378] sm:$0xff]  ;;  %v1050_v4 = vpack.c.bf16 %v167_v0, %v166_v63  ;;  %v505_v9 = vld [vmem:[#allocation7 + $0x8] sm:$0xff] }
  0x77   :  { %1063 = vmatpush3.bf16.msra.mxu1 %v1062_v11  ;;  %v1082_v5 = vpack.c.bf16 %v199_v3, %v198_v2  ;;  %v86_v7 = vld [vmem:[#allocation2 + $0x30] sm:$0xff]  ;;  %v1266_v11 = vmov 0.0|0.0   ;;  %v1085_v12 = vpack.c.bf16 %v505_v9, %v504_v8  ;;  %v507_v13 = vld [vmem:[#allocation7 + $0x18] sm:$0xff]  ;;  %v508_v15 = vld [vmem:[#allocation7 + $0x20] sm:$0xff] }
  0x78   :  { %1065 = vmatprep.subr.bf16.mxu1 %v1064_v16  ;;  %v506_v10 = vld [vmem:[#allocation7 + $0x10] sm:$0xff]  ;;  %v509_v16 = vld [vmem:[#allocation7 + $0x28] sm:$0xff]  ;;  %v511_v19 = vld [vmem:[#allocation7 + $0x38] sm:$0xff] }
  0x79   :  { %1035 = vmatpush3.bf16.msra.mxu0 %v1034_v22  ;;  %v1088_v14 = vpack.c.bf16 %v507_v13, %v506_v10  ;;  %v1091_v17 = vpack.c.bf16 %v509_v16, %v508_v15  ;;  %v510_v18 = vld [vmem:[#allocation7 + $0x30] sm:$0xff]  ;;  %v512_v21 = vld [vmem:[#allocation7 + $0x40] sm:$0xff]  ;;  %v513_v22 = vld [vmem:[#allocation7 + $0x48] sm:$0xff] }
  0x7a   :  { %1037 = vmatprep.subr.bf16.mxu0 %v1036_v26  ;;  %v1094_v20 = vpack.c.bf16 %v511_v19, %v510_v18  ;;  %v1097_v23 = vpack.c.bf16 %v513_v22, %v512_v21  ;;  %v514_v24 = vld [vmem:[#allocation7 + $0x50] sm:$0xff]  ;;  %v516_v27 = vld [vmem:[#allocation7 + $0x60] sm:$0xff]  ;;  %v517_v28 = vld [vmem:[#allocation7 + $0x68] sm:$0xff] }
  0x7b   :  { %1067 = vmatpush3.bf16.msra.mxu1 %v1066_v25  ;;  %v515_v25 = vld [vmem:[#allocation7 + $0x58] sm:$0xff]  ;;  %v1103_v29 = vpack.c.bf16 %v517_v28, %v516_v27  ;;  %v598_v34 = vld [vmem:[#allocation8] sm:$0xff]  ;;  %v599_v35 = vld [vmem:[#allocation8 + $0x8] sm:$0xff] }
  0x7c   :  { %1069 = vmatprep.subr.bf16.mxu1 %v1068_v30  ;;  %v1100_v26 = vpack.c.bf16 %v515_v25, %v514_v24  ;;  %v518_v30 = vld [vmem:[#allocation7 + $0x70] sm:$0xff]  ;;  %v519_v31 = vld [vmem:[#allocation7 + $0x78] sm:$0xff]  ;;  %v602_v40 = vld [vmem:[#allocation8 + $0x20] sm:$0xff] }
  0x7d   :  { %1039 = vmatpush3.bf16.msra.mxu0 %v1038_v36  ;;  %v1106_v32 = vpack.c.bf16 %v519_v31, %v518_v30  ;;  %v600_v36 = vld [vmem:[#allocation8 + $0x10] sm:$0xff]  ;;  %v603_v41 = vld [vmem:[#allocation8 + $0x28] sm:$0xff]  ;;  %v605_v44 = vld [vmem:[#allocation8 + $0x38] sm:$0xff] }
  0x7e   :  { %1041 = vmatprep.subr.bf16.mxu0 %v1040_v38  ;;  %v601_v38 = vld [vmem:[#allocation8 + $0x18] sm:$0xff]  ;;  %v604_v43 = vld [vmem:[#allocation8 + $0x30] sm:$0xff]  ;;  %v606_v46 = vld [vmem:[#allocation8 + $0x40] sm:$0xff] }
  0x7f   :  { %1071 = vmatpush3.bf16.msra.mxu1 %v1070_v37  ;;  %v1109_v37 = vpack.c.bf16 %v599_v35, %v598_v34  ;;  %v1112_v39 = vpack.c.bf16 %v601_v38, %v600_v36  ;;  %v1118_v45 = vpack.c.bf16 %v605_v44, %v604_v43  ;;  %v607_v47 = vld [vmem:[#allocation8 + $0x48] sm:$0xff]  ;;  %v610_v52 = vld [vmem:[#allocation8 + $0x60] sm:$0xff]  ;;  %v612_v9 = vld [vmem:[#allocation8 + $0x70] sm:$0xff] }
  0x80   :  { %1073 = vmatprep.subr.bf16.mxu1 %v1072_v42  ;;  %v1115_v42 = vpack.c.bf16 %v603_v41, %v602_v40  ;;  %v611_v53 = vld [vmem:[#allocation8 + $0x68] sm:$0xff]  ;;  %v709_v56 = vld [vmem:[%s1406_s2] ss:$0 sm:$0xff]  ;;  %v613_v10 = vld [vmem:[#allocation8 + $0x78] sm:$0xff] }
  0x81   :  { %1043 = vmatpush3.bf16.msra.mxu0 %v1042_v48  ;;  %v1121_v48 = vpack.c.bf16 %v607_v47, %v606_v46 }
  0x82   :  { %1045 = vmatprep.subr.bf16.mxu0 %v1044_v50  ;;  %v609_v50 = vld [vmem:[#allocation8 + $0x58] sm:$0xff] }
  0x83   :  { %1075 = vmatpush3.bf16.msra.mxu1 %v1074_v49  ;;  %v608_v49 = vld [vmem:[#allocation8 + $0x50] sm:$0xff] }
  0x84   :  { %1077 = vmatprep.subr.bf16.mxu1 %v1076_v54  ;;  %v1124_v51 = vpack.c.bf16 %v609_v50, %v608_v49  ;;  %v1127_v54 = vpack.c.bf16 %v611_v53, %v610_v52 }
  0x85   :  { %1047 = vmatpush3.bf16.msra.mxu0 %v1046_v60 }
  0x86   :  { %1049 = vmatprep.subr.bf16.mxu0 %v1048_v62 }
  0x87   :  { %1079 = vmatpush3.bf16.msra.mxu1 %v1078_v61 }
  0x88   :  { %1081 = vmatprep.subr.bf16.mxu1 %v1080_v1 }
  0x89   :  { %1051 = vmatpush3.bf16.msra.mxu0 %v1050_v4 }
  0x8a   :  { %1084 = vmatprep.subr.bf16.mxu0 %v1266_v11 }
  0x8b   :  { %1083 = vmatpush3.bf16.msra.mxu1 %v1082_v5 }
  0x8c   :  { %428 = vmatmul.mubr.f32.vlgmr.msra.gmra.mrb[2].mxu0 %v84_v6  ;;  %1108 = vmatprep.subr.bf16.mxu1 %v1266_v11 }
  0x8d   :  { %1086 = vmatpush3.bf16.msra.mxu0 %v1085_v12  ;;  %918 = vmatprep.mubr.msk.f32.mxu0 %vm1267_vm0, %v1268_v33  ;;  %v710_v12 = vld [vmem:[%s1408_s4] ss:$0 sm:$0xff] }
  0x8e   :  { %498 = vmatmul.mubr.f32.vlgmr.msra.gmra.mrb[2].mxu1 %v86_v7  ;;  %1087 = vmatprep.subr.bf16.mxu0 %v1266_v11 }
  0x8f   :  { %953 = vmatprep.mubr.msk.f32.mxu1 %vm1267_vm0, %v1268_v33  ;;  %1110 = vmatpush3.bf16.msra.mxu1 %v1109_v37 }
  0x90   :  { %1111 = vmatprep.subr.bf16.mxu1 %v1266_v11 }
  0x91   :  { %1089 = vmatpush3.bf16.msra.mxu0 %v1088_v14 }
  0x92   :  { %1090 = vmatprep.subr.bf16.mxu0 %v1266_v11 }
  0x93   :  { %1113 = vmatpush3.bf16.msra.mxu1 %v1112_v39 }
  0x94   :  { %1114 = vmatprep.subr.bf16.mxu1 %v1266_v11 }
  0x95   :  { %1092 = vmatpush3.bf16.msra.mxu0 %v1091_v17  ;;  %v711_v17 = vld [vmem:[%s1410_s6] ss:$0 sm:$0xff] }
  0x96   :  { %1093 = vmatprep.subr.bf16.mxu0 %v1266_v11 }
  0x97   :  { %1116 = vmatpush3.bf16.msra.mxu1 %v1115_v42 }
  0x98   :  { %1117 = vmatprep.subr.bf16.mxu1 %v1266_v11 }
  0x99   :  { %1095 = vmatpush3.bf16.msra.mxu0 %v1094_v20 }
  0x9a   :  { %1096 = vmatprep.subr.bf16.mxu0 %v1266_v11 }
  0x9b   :  { %1119 = vmatpush3.bf16.msra.mxu1 %v1118_v45 }
  0x9c   :  { %1120 = vmatprep.subr.bf16.mxu1 %v1266_v11 }
  0x9d   :  { %1098 = vmatpush3.bf16.msra.mxu0 %v1097_v23 }
  0x9e   :  { %1099 = vmatprep.subr.bf16.mxu0 %v1266_v11 }
  0x9f   :  { %1122 = vmatpush3.bf16.msra.mxu1 %v1121_v48 }
  0xa0   :  { %1123 = vmatprep.subr.bf16.mxu1 %v1266_v11 }
  0xa1   :  { %1101 = vmatpush3.bf16.msra.mxu0 %v1100_v26 }
  0xa2   :  { %1102 = vmatprep.subr.bf16.mxu0 %v1266_v11 }
  0xa3   :  { %1125 = vmatpush3.bf16.msra.mxu1 %v1124_v51 }
  0xa4   :  { %1126 = vmatprep.subr.bf16.mxu1 %v1266_v11 }
  0xa5   :  { %1104 = vmatpush3.bf16.msra.mxu0 %v1103_v29 }
  0xa6   :  { %1105 = vmatprep.subr.bf16.mxu0 %v1266_v11 }
  0xa7   :  { %1128 = vmatpush3.bf16.msra.mxu1 %v1127_v54 }
  0xa8   :  { %1129 = vmatprep.subr.bf16.mxu1 %v1266_v11  ;;  %v1130_v11 = vpack.c.bf16 %v613_v10, %v612_v9 }
  0xa9   :  { %1107 = vmatpush3.bf16.msra.mxu0 %v1106_v32 }
  0xab   :  { %1131 = vmatpush3.bf16.msra.mxu1 %v1130_v11 }
 0x13f   :  { %v744_v55 = vpop.f32.mrb[0].mxu0 }
 0x140   :  { %v745_v57 = vpop.f32.mrb[1].mxu0 }
 0x141   :  { %v779_v58 = vpop.f32.mrb[0].mxu1  ;;  %v746_v59 = vadd.f32 %v745_v57, %v744_v55 }
 0x142   :  { %v780_v60 = vpop.f32.mrb[1].mxu1 }
 0x143   :  { %v781_v61 = vadd.f32 %v780_v60, %v779_v58  ;;  %v290_v62 = vadd.f32 %v746_v59, %v709_v56 }
 0x145   :  { %v360_v63 = vadd.f32 %v781_v61, %v290_v62 }
 0x15f   :  { %v814_v0 = vpop.f32.mrb[2].mxu0 }
 0x160   :  { %v815_v1 = vpop.f32.mrb[3].mxu0 }
 0x161   :  { %v849_v2 = vpop.f32.mrb[2].mxu1  ;;  %v816_v3 = vadd.f32 %v815_v1, %v814_v0 }
 0x162   :  { %v850_v4 = vpop.f32.mrb[3].mxu1 }
 0x163   :  { %v851_v5 = vadd.f32 %v850_v4, %v849_v2  ;;  %v430_v6 = vadd.f32 %v816_v3, %v360_v63 }
 0x165   :  { %v500_v7 = vadd.f32 %v851_v5, %v430_v6 }
 0x167   :  { %v503_v8 = vmax.f32 %v500_v7, 0.0 }
 0x169   :  { %919 = vmatmul.mubr.f32.vlgmr.msra.gmra.mrb[4].mxu0 %v503_v8 }
 0x23c   :  { %v593_v13 = vpop.f32.mrb[4].mxu0 }
 0x23d   :  { %v594_v14 = vadd.f32 %v710_v12, %v593_v13  ;;  %v920_v15 = vpop.f32.mrb[5].mxu0 }
 0x23f   :  { %v597_v16 = vmax.f32 %v594_v14, 0.0 }
 0x241   :  { %954 = vmatmul.mubr.f32.vlgmr.msra.gmra.mrb[4].mxu1 %v597_v16 }
 0x314   :  { %v687_v18 = vpop.f32.mrb[4].mxu1 }
 0x315   :  { %v688_v19 = vadd.f32 %v711_v17, %v687_v18  ;;  %v955_v20 = vpop.f32.mrb[5].mxu1 }
 0x317   :  { %691 = vst [vmem:[#allocation10] sm:$0xff] %v688_v19 }
 0x318   :  { %1241 = shalt.err (!%p1238_p8)
}
 0x319   :  { %s1242_s9 = scalar_lea.hbm %s1411_s7, 128 }
 0x31a   :  { %p1243_p9 = scmp.ne.s32.totalorder %s1411_s7, %s1242_s9  ;;  %p1246_p10 = scmp.lt.u32.totalorder %s1242_s9, %s1411_s7 }
 0x31c   :  { %p1248_p11 = pnand %p1246_p10, %p1243_p9 }
 0x31e   :  { %1251 = shalt.err (!%p1248_p11)
}
 0x31f   :  { %701 = dma.vmem_to_hbm [thread:$0]  %s699_s29, 128, %s1411_s7, [#allocation4]  }
 0x320   :  { %1258 = dma.done.wait [#allocation4], 128  }
 0x321   :  { %1259 = vsyncadd [#allocation4], 4294967168 }
 0x322   :  { %705 = vsyncpa [#allocation3], 1 }
 0x323   :  { %706 = vsyncpa [#allocation6], 1 }
 0x324   :  { %707 = vsyncpa [#allocation9], 1 }
 0x325   :  { %708 = vsyncpa [#allocation4], 1 }

</bundles_post_ra>
